<compile_context>
chip_gen: v5e
topology: v5e:2x2
jax: 0.10.0
libtpu: 0.0.40
codegen_flags: <defaults>
</compile_context>

<pallas_src>
import functools

import numpy as np

import jax
import jax.numpy as jnp
from jax import lax
from jax.experimental import pallas as pl
from jax.experimental.pallas import tpu as pltpu

EPS = 1e-5
ACT_DTYPE = jnp.bfloat16   # inter-layer activation storage (HBM/DMA)
MXU_DTYPE = jnp.bfloat16   # MXU operand dtype (accumulation is always f32)


# ----------------------------------------------------------------------------
# In-kernel helpers
# ----------------------------------------------------------------------------
def _shift_up(x, img_rows):
    """result[r] = x[r-1]; zero on each image's first row (r % img_rows == 0)."""
    rows, cols = x.shape
    zero_row = jnp.zeros((1, cols), x.dtype)
    shifted = jnp.concatenate([zero_row, x[:-1, :]], axis=0)
    if rows == img_rows:            # single image per block: edge row already zero
        return shifted
    r = lax.broadcasted_iota(jnp.int32, (rows, 1), 0)
    return jnp.where((r % img_rows) == 0, jnp.zeros_like(shifted), shifted)


def _shift_down(x, img_rows):
    """result[r] = x[r+1]; zero on each image's last row."""
    rows, cols = x.shape
    zero_row = jnp.zeros((1, cols), x.dtype)
    shifted = jnp.concatenate([x[1:, :], zero_row], axis=0)
    if rows == img_rows:
        return shifted
    r = lax.broadcasted_iota(jnp.int32, (rows, 1), 0)
    return jnp.where((r % img_rows) == (img_rows - 1), jnp.zeros_like(shifted), shifted)


def _conv3x3_rows(x_up, x_mid, x_dn, band_ref):
    """3x3 'same' conv as 3 per-dh accumulating MXU dots on row-flattened data.

    band_ref: (3, W_in*Cin, W_out*Cout); the dw taps and W zero-padding are
    folded into each per-dh band.  Returns f32 (rows, W_out*Cout).
    """
    f32 = jnp.float32
    bt = band_ref.dtype
    return (jnp.dot(x_up.astype(bt), band_ref[0], preferred_element_type=f32)
            + jnp.dot(x_mid.astype(bt), band_ref[1], preferred_element_type=f32)
            + jnp.dot(x_dn.astype(bt), band_ref[2], preferred_element_type=f32))


# ----------------------------------------------------------------------------
# Fused per-layer Pallas kernels (one pallas_call per EncoderResidualLayer)
# ----------------------------------------------------------------------------
def enc_layer_kernel(x_ref, band1_ref, s1_ref, t1_ref,
                     band2_ref, s2_ref, t2_ref, out_ref, *, img_rows):
    """downsample=False: Conv3x3 -> BN1 -> ReLU -> Conv3x3 -> BN2 -> +x -> ReLU."""
    f32 = jnp.float32
    xb = x_ref[...]                       # (R, W*C) bf16, R = img_block * H
    xf = xb.astype(f32)
    x_up = _shift_up(xf, img_rows)
    x_dn = _shift_down(xf, img_rows)
    h = _conv3x3_rows(x_up, xb, x_dn, band1_ref)
    h = jnp.maximum(h * s1_ref[...] + t1_ref[...], 0.0)          # BN1 + ReLU (f32)
    h_up = _shift_up(h, img_rows)
    h_dn = _shift_down(h, img_rows)
    y = _conv3x3_rows(h_up, h, h_dn, band2_ref)
    y = y * s2_ref[...] + t2_ref[...]                             # BN2
    out_ref[...] = jnp.maximum(y + xf, 0.0).astype(out_ref.dtype)  # +identity, ReLU


def enc_layer_ds_kernel(xp_ref, band1_ref, s1_ref, t1_ref,
                        band2_ref, s2_ref, t2_ref,
                        ds_ref, sd_ref, td_ref, out_ref, *, img_rows):
    """downsample=True (layer 0):
       Conv3x3/s2 -> BN1 -> ReLU -> Conv3x3 -> BN2; identity = Conv1x1/s2 -> BNd;
       out = ReLU(main + identity).  Input rows arrive packed in pairs:
       block row ho = [x[2*ho] | x[2*ho+1]] so the stride-2 conv is gather-free."""
    f32 = jnp.float32
    xp = xp_ref[...]                      # (R, 2*W*Cin) bf16, R = img_block * Ho
    wc = xp.shape[1] // 2
    x_even = xp[:, :wc]                   # input rows 2*ho      (dh = 1 tap)
    x_odd = xp[:, wc:]                    # input rows 2*ho + 1  (dh = 2 tap)
    x_odd_up = _shift_up(x_odd.astype(f32), img_rows)            # rows 2*ho - 1 (dh = 0)
    h = _conv3x3_rows(x_odd_up, x_even, x_odd, band1_ref)
    h = jnp.maximum(h * s1_ref[...] + t1_ref[...], 0.0)          # BN1 + ReLU
    h_up = _shift_up(h, img_rows)
    h_dn = _shift_down(h, img_rows)
    y = _conv3x3_rows(h_up, h, h_dn, band2_ref)
    y = y * s2_ref[...] + t2_ref[...]                             # BN2
    # Downsample identity: Conv1x1/stride2 + BNd.  x_even is already resident
    # (reused from conv1); the even-column selection is folded into ds_ref.
    idn = jnp.dot(x_even.astype(ds_ref.dtype), ds_ref[...],
                  preferred_element_type=f32)
    idn = idn * sd_ref[...] + td_ref[...]
    out_ref[...] = jnp.maximum(y + idn, 0.0).astype(out_ref.dtype)


# ----------------------------------------------------------------------------
# pallas_call launcher: grid over image blocks, weights resident in VMEM
# ----------------------------------------------------------------------------
def _launch_layer(kernel, acts, params, *, n_imgs, img_block,
                  out_rows_per_img, out_cols, out_dtype):
    grid_steps = n_imgs // img_block
    in_specs = []
    for a in acts:                        # 2-D (N*rows_per_img, lanes) activations
        blk_rows = a.shape[0] // grid_steps
        in_specs.append(pl.BlockSpec((blk_rows, a.shape[1]), lambda i: (i, 0)))
    for w in params:                      # small weights / BN rows: constant index map
        nd = w.ndim
        in_specs.append(pl.BlockSpec(w.shape, lambda i, nd=nd: (0,) * nd))
    out_blk_rows = img_block * out_rows_per_img
    return pl.pallas_call(
        kernel,
        out_shape=jax.ShapeDtypeStruct((n_imgs * out_rows_per_img, out_cols), out_dtype),
        grid=(grid_steps,),
        in_specs=in_specs,
        out_specs=pl.BlockSpec((out_blk_rows, out_cols), lambda i: (i, 0)),
        compiler_params=pltpu.CompilerParams(
            dimension_semantics=("parallel",),
            vmem_limit_bytes=64 * 1024 * 1024),
    )(*acts, *params)


# ----------------------------------------------------------------------------
# One-time parameter preprocessing (hoisted out of the forward pass)
# ----------------------------------------------------------------------------
def fold_bn(bn, width, eps=EPS):
    gamma, beta, mean, var = bn
    scale = gamma / jnp.sqrt(var + eps)
    shift = beta - mean * scale
    return (jnp.tile(scale, width)[None, :].astype(jnp.float32),
            jnp.tile(shift, width)[None, :].astype(jnp.float32))


def band_stack(w_oihw, w_in, stride):
    """Per-dh banded weights (3, W_in*Cin, W_out*Cout) for a k=3, pad=1 conv."""
    cout, cin = w_oihw.shape[0], w_oihw.shape[1]
    w_out = w_in // stride
    wt = jnp.transpose(w_oihw, (2, 3, 1, 0))             # (dh, dw, Cin, Cout)
    sel = np.zeros((3, w_in, w_out), np.float32)         # (dw, wi, wo)
    for dw in range(3):
        for wo in range(w_out):
            wi = stride * wo + dw - 1
            if 0 <= wi < w_in:
                sel[dw, wi, wo] = 1.0
    band = jnp.einsum("dio,hdcu->hicou", jnp.asarray(sel), wt)
    return band.reshape(3, w_in * cin, w_out * cout).astype(MXU_DTYPE)


def downsample_matrix(wd_oihw, w_in):
    """Weight matrix (W_in*Cin, W_out*Cout) for the 1x1 stride-2 conv applied to
    the even input rows (even-column selection folded in)."""
    cout, cin = wd_oihw.shape[0], wd_oihw.shape[1]
    w_out = w_in // 2
    wt = jnp.transpose(wd_oihw[:, :, 0, 0], (1, 0))      # (Cin, Cout)
    sel = np.zeros((w_in, w_out), np.float32)
    for wo in range(w_out):
        sel[2 * wo, wo] = 1.0
    mat = jnp.einsum("io,cu->icou", jnp.asarray(sel), wt)
    return mat.reshape(w_in * cin, w_out * cout).astype(MXU_DTYPE)


def prepare_block_params(raw_layers, width):
    """Build per-dh band matrices + folded BN once (not per forward call)."""
    prepped = []
    w_in = width
    for i, lp in enumerate(raw_layers):
        downsample = i == 0
        stride = 2 if downsample else 1
        assert w_in % stride == 0
        w_out = w_in // stride
        cout = lp["w1"].shape[0]
        p = {"downsample": downsample, "cout": cout,
             "band1": band_stack(lp["w1"], w_in, stride),
             "band2": band_stack(lp["w2"], w_out, 1)}
        p["scale1"], p["shift1"] = fold_bn(lp["bn1"], w_out)
        p["scale2"], p["shift2"] = fold_bn(lp["bn2"], w_out)
        if downsample:
            p["ds"] = downsample_matrix(lp["wd"], w_in)
            p["ds_scale"], p["ds_shift"] = fold_bn(lp["bnd"], w_out)
        prepped.append(p)
        w_in = w_out
    return prepped


# ----------------------------------------------------------------------------
# EncoderResidualBlock forward (Pallas)
# ----------------------------------------------------------------------------
def encoder_residual_block(x_nchw, prepped, img_block=None):
    """NCHW in / NCHW f32 out; lane-dense bf16 (N*H, W*C) rows internally."""
    x = jnp.transpose(x_nchw, (0, 2, 3, 1))              # NHWC
    n, h, w, c = x.shape
    if img_block is None:
        # Batch enough images per grid step to give the MXU >= ~128 matmul rows;
        # the remaining N // img_block grid steps are 'parallel' (v7x megacore)
        # when the batch is larger than that.
        target = max(1, 128 // max(h, 1))
        img_block = 1
        for d in range(1, n + 1):
            if n % d == 0 and d <= target:
                img_block = d
    cur = x.astype(ACT_DTYPE).reshape(n * h, w * c)      # free reshape; bf16 in HBM
    for p in prepped:
        cout = p["cout"]
        if p["downsample"]:
            assert h % 2 == 0 and w % 2 == 0
            ho, wo = h // 2, w // 2
            x_pairs = cur.reshape(n * ho, 2 * w * c)     # row ho = [row 2ho | row 2ho+1]
            kern = functools.partial(enc_layer_ds_kernel, img_rows=ho)
            cur = _launch_layer(
                kern, [x_pairs],
                [p["band1"], p["scale1"], p["shift1"],
                 p["band2"], p["scale2"], p["shift2"],
                 p["ds"], p["ds_scale"], p["ds_shift"]],
                n_imgs=n, img_block=img_block,
                out_rows_per_img=ho, out_cols=wo * cout, out_dtype=ACT_DTYPE)
            h, w, c = ho, wo, cout
        else:
            kern = functools.partial(enc_layer_kernel, img_rows=h)
            cur = _launch_layer(
                kern, [cur],
                [p["band1"], p["scale1"], p["shift1"],
                 p["band2"], p["scale2"], p["shift2"]],
                n_imgs=n, img_block=img_block,
                out_rows_per_img=h, out_cols=w * cout, out_dtype=ACT_DTYPE)
            c = cout
    out = cur.reshape(n, h, w, c).astype(jnp.float32)
    return jnp.transpose(out, (0, 3, 1, 2))              # back to NCHW


# ----------------------------------------------------------------------------
# Pure-JAX f32 reference (lax convolutions) for validation
# ----------------------------------------------------------------------------
def _ref_bn(y, p):
    g, b, m, v = p
    s = g / jnp.sqrt(v + EPS)
    t = b - m * s
    return y * s[None, :, None, None] + t[None, :, None, None]


def ref_encoder_layer(x, lp, downsample):
    hp = lax.Precision.HIGHEST
    dn = ("NCHW", "OIHW", "NCHW")
    stride = (2, 2) if downsample else (1, 1)
    h = lax.conv_general_dilated(x, lp["w1"], stride, ((1, 1), (1, 1)),
                                 dimension_numbers=dn, precision=hp)
    h = jnp.maximum(_ref_bn(h, lp["bn1"]), 0.0)
    h = lax.conv_general_dilated(h, lp["w2"], (1, 1), ((1, 1), (1, 1)),
                                 dimension_numbers=dn, precision=hp)
    h = _ref_bn(h, lp["bn2"])
    if downsample:
        idn = lax.conv_general_dilated(x, lp["wd"], (2, 2), ((0, 0), (0, 0)),
                                       dimension_numbers=dn, precision=hp)
        idn = _ref_bn(idn, lp["bnd"])
    else:
        idn = x
    return jnp.maximum(h + idn, 0.0)


def ref_encoder_block(x, raw_layers):
    for i, lp in enumerate(raw_layers):
        x = ref_encoder_layer(x, lp, downsample=(i == 0))
    return x


# ----------------------------------------------------------------------------
# Deterministic parameter init (PyTorch tensor layouts)
# ----------------------------------------------------------------------------
def _bn_init(key, c):
    k1, k2, k3, k4 = jax.random.split(key, 4)
    gamma = jax.random.uniform(k1, (c,), jnp.float32, 0.5, 1.5)
    beta = 0.1 * jax.random.normal(k2, (c,), jnp.float32)
    mean = 0.1 * jax.random.normal(k3, (c,), jnp.float32)
    var = jax.random.uniform(k4, (c,), jnp.float32, 0.5, 1.5)
    return (gamma, beta, mean, var)


def init_block_params(key, in_channels, hidden_channels, layers):
    raw = []
    for i in range(layers):
        cin = in_channels if i == 0 else hidden_channels
        key, k1, k2, k3, k4, k5, k6 = jax.random.split(key, 7)
        lp = {
            "w1": 0.1 * jax.random.normal(k1, (hidden_channels, cin, 3, 3), jnp.float32),
            "bn1": _bn_init(k2, hidden_channels),
            "w2": 0.1 * jax.random.normal(k3, (hidden_channels, hidden_channels, 3, 3),
                                          jnp.float32),
            "bn2": _bn_init(k4, hidden_channels),
        }
        if i == 0:
            lp["wd"] = 0.1 * jax.random.normal(k5, (hidden_channels, cin, 1, 1),
                                               jnp.float32)
            lp["bnd"] = _bn_init(k6, hidden_channels)
        raw.append(lp)
    return raw


# ----------------------------------------------------------------------------
# Demo
# ----------------------------------------------------------------------------
if __name__ == "__main__":
    key = jax.random.PRNGKey(0)
    N, Cin, H, W = 2, 8, 16, 16
    hidden_channels, layers = 16, 2

    key, kx, kp = jax.random.split(key, 3)
    x = jax.random.normal(kx, (N, Cin, H, W), jnp.float32)   # NCHW like PyTorch
    raw_params = init_block_params(kp, Cin, hidden_channels, layers)
    prepped = prepare_block_params(raw_params, W)

    out = encoder_residual_block(x, prepped)
    out = jax.block_until_ready(out)

    ref = ref_encoder_block(x, raw_params)
    assert out.shape == ref.shape, (out.shape, ref.shape)
    err = float(jnp.max(jnp.abs(out - ref)))
    ref_max = float(jnp.max(jnp.abs(ref)))
    # Tolerance is relaxed because the kernel uses bf16 activations / MXU
    # operands with f32 accumulation, while the reference runs fully in f32.
    tol = 5e-2 * (1.0 + ref_max)
    assert err < tol, f"mismatch: max abs err={err}, tol={tol}"

    print("KERNEL_OK")
</pallas_src>

<mosaic_0001>
module attributes {stable_mosaic.version = 11 : i64} {
  func.func @enc_layer_ds_kernel(%arg0: i32, %arg1: memref<16x256xbf16, #tpu.memory_space<vmem>>, %arg2: memref<3x128x128xbf16, #tpu.memory_space<vmem>>, %arg3: memref<1x128xf32, #tpu.memory_space<vmem>>, %arg4: memref<1x128xf32, #tpu.memory_space<vmem>>, %arg5: memref<3x128x128xbf16, #tpu.memory_space<vmem>>, %arg6: memref<1x128xf32, #tpu.memory_space<vmem>>, %arg7: memref<1x128xf32, #tpu.memory_space<vmem>>, %arg8: memref<128x128xbf16, #tpu.memory_space<vmem>>, %arg9: memref<1x128xf32, #tpu.memory_space<vmem>>, %arg10: memref<1x128xf32, #tpu.memory_space<vmem>>, %arg11: memref<16x128xbf16, #tpu.memory_space<vmem>>) attributes {dimension_semantics = [#tpu.dimension_semantics<parallel>], iteration_bounds = array<i64: 1>, scalar_prefetch = 0 : i64, scratch_operands = 0 : i64, tpu.core_type = #tpu.core_type<tc>, window_params = [{transform_indices = @transform_0, window_bounds = array<i64: 16, 256>}, {pipeline_mode = #tpu.pipeline_mode<synchronous>, transform_indices = @transform_1, window_bounds = array<i64: 3, 128, 128>}, {pipeline_mode = #tpu.pipeline_mode<synchronous>, transform_indices = @transform_2, window_bounds = array<i64: 1, 128>}, {pipeline_mode = #tpu.pipeline_mode<synchronous>, transform_indices = @transform_3, window_bounds = array<i64: 1, 128>}, {pipeline_mode = #tpu.pipeline_mode<synchronous>, transform_indices = @transform_4, window_bounds = array<i64: 3, 128, 128>}, {pipeline_mode = #tpu.pipeline_mode<synchronous>, transform_indices = @transform_5, window_bounds = array<i64: 1, 128>}, {pipeline_mode = #tpu.pipeline_mode<synchronous>, transform_indices = @transform_6, window_bounds = array<i64: 1, 128>}, {pipeline_mode = #tpu.pipeline_mode<synchronous>, transform_indices = @transform_7, window_bounds = array<i64: 128, 128>}, {pipeline_mode = #tpu.pipeline_mode<synchronous>, transform_indices = @transform_8, window_bounds = array<i64: 1, 128>}, {pipeline_mode = #tpu.pipeline_mode<synchronous>, transform_indices = @transform_9, window_bounds = array<i64: 1, 128>}, {transform_indices = @transform_10, window_bounds = array<i64: 16, 128>}]} {
    %c0 = arith.constant 0 : index
    %c0_0 = arith.constant 0 : index
    %0 = vector.load %arg1[%c0, %c0_0] : memref<16x256xbf16, #tpu.memory_space<vmem>>, vector<16x256xbf16>
    %1 = vector.extract_strided_slice %0 {offsets = [0, 0], sizes = [16, 128], strides = [1, 1]} : vector<16x256xbf16> to vector<16x128xbf16>
    %2 = vector.extract_strided_slice %0 {offsets = [0, 128], sizes = [16, 128], strides = [1, 1]} : vector<16x256xbf16> to vector<16x128xbf16>
    %3 = arith.extf %2 : vector<16x128xbf16> to vector<16x128xf32>
    %cst = arith.constant 0.000000e+00 : f32
    %4 = vector.broadcast %cst : f32 to vector<1x128xf32>
    %5 = vector.extract_strided_slice %3 {offsets = [0, 0], sizes = [15, 128], strides = [1, 1]} : vector<16x128xf32> to vector<15x128xf32>
    %6 = tpu.concatenate %4, %5 in 0 : vector<1x128xf32>, vector<15x128xf32> -> vector<16x128xf32>
    %7 = tpu.iota {dimensions = array<i32: 0>} : vector<16x1xi32>
    %c8_i32 = arith.constant 8 : i32
    %c0_i32 = arith.constant 0 : i32
    %8 = arith.cmpi eq, %c8_i32, %c0_i32 : i32
    %c1_i32 = arith.constant 1 : i32
    %9 = arith.select %8, %c1_i32, %c8_i32 : i32
    %10 = vector.broadcast %9 : i32 to vector<16x1xi32>
    %11 = arith.remsi %7, %10 : vector<16x1xi32>
    %c0_i32_1 = arith.constant 0 : i32
    %12 = vector.broadcast %c0_i32_1 : i32 to vector<16x1xi32>
    %13 = arith.cmpi ne, %11, %12 : vector<16x1xi32>
    %c0_i32_2 = arith.constant 0 : i32
    %14 = vector.broadcast %c0_i32_2 : i32 to vector<16x1xi32>
    %15 = arith.cmpi slt, %11, %14 : vector<16x1xi32>
    %c0_i32_3 = arith.constant 0 : i32
    %16 = arith.cmpi slt, %9, %c0_i32_3 : i32
    %17 = vector.broadcast %16 : i1 to vector<16x1xi1>
    %18 = vector.broadcast %17 : vector<16x1xi1> to vector<16x1xi1>
    %19 = arith.xori %15, %18 : vector<16x1xi1>
    %20 = arith.andi %19, %13 : vector<16x1xi1>
    %21 = vector.broadcast %9 : i32 to vector<16x1xi32>
    %22 = arith.addi %11, %21 : vector<16x1xi32>
    %23 = arith.select %20, %22, %11 : vector<16x1xi1>, vector<16x1xi32>
    %c0_i32_4 = arith.constant 0 : i32
    %24 = vector.broadcast %c0_i32_4 : i32 to vector<16x1xi32>
    %25 = arith.cmpi eq, %23, %24 : vector<16x1xi32>
    %cst_5 = arith.constant 0.000000e+00 : f32
    %26 = vector.broadcast %cst_5 : f32 to vector<16x128xf32>
    %27 = vector.shape_cast %25 : vector<16x1xi1> to vector<16x1xi1>
    %28 = vector.broadcast %27 : vector<16x1xi1> to vector<16x128xi1>
    %29 = arith.select %28, %26, %6 : vector<16x128xi1>, vector<16x128xf32>
    %30 = arith.truncf %29 : vector<16x128xf32> to vector<16x128xbf16>
    %c0_6 = arith.constant 0 : index
    %c0_7 = arith.constant 0 : index
    %c0_8 = arith.constant 0 : index
    %31 = vector.load %arg2[%c0_6, %c0_7, %c0_8] : memref<3x128x128xbf16, #tpu.memory_space<vmem>>, vector<1x128x128xbf16>
    %32 = vector.shape_cast %31 : vector<1x128x128xbf16> to vector<128x128xbf16>
    %cst_9 = arith.constant dense<0.000000e+00> : vector<16x128xf32>
    %33 = tpu.matmul %30, %32, %cst_9 {dimension_numbers = #tpu.dot_dimension_numbers<[1], [0], [0], [1], [0, 0, 1, 1], [], []>} : vector<16x128xbf16>, vector<128x128xbf16>, vector<16x128xf32> -> vector<16x128xf32>
    %c1 = arith.constant 1 : index
    %c0_10 = arith.constant 0 : index
    %c0_11 = arith.constant 0 : index
    %34 = vector.load %arg2[%c1, %c0_10, %c0_11] : memref<3x128x128xbf16, #tpu.memory_space<vmem>>, vector<1x128x128xbf16>
    %35 = vector.shape_cast %34 : vector<1x128x128xbf16> to vector<128x128xbf16>
    %cst_12 = arith.constant dense<0.000000e+00> : vector<16x128xf32>
    %36 = tpu.matmul %1, %35, %cst_12 {dimension_numbers = #tpu.dot_dimension_numbers<[1], [0], [0], [1], [0, 0, 1, 1], [], []>} : vector<16x128xbf16>, vector<128x128xbf16>, vector<16x128xf32> -> vector<16x128xf32>
    %37 = arith.addf %33, %36 : vector<16x128xf32>
    %c2 = arith.constant 2 : index
    %c0_13 = arith.constant 0 : index
    %c0_14 = arith.constant 0 : index
    %38 = vector.load %arg2[%c2, %c0_13, %c0_14] : memref<3x128x128xbf16, #tpu.memory_space<vmem>>, vector<1x128x128xbf16>
    %39 = vector.shape_cast %38 : vector<1x128x128xbf16> to vector<128x128xbf16>
    %cst_15 = arith.constant dense<0.000000e+00> : vector<16x128xf32>
    %40 = tpu.matmul %2, %39, %cst_15 {dimension_numbers = #tpu.dot_dimension_numbers<[1], [0], [0], [1], [0, 0, 1, 1], [], []>} : vector<16x128xbf16>, vector<128x128xbf16>, vector<16x128xf32> -> vector<16x128xf32>
    %41 = arith.addf %37, %40 : vector<16x128xf32>
    %c0_16 = arith.constant 0 : index
    %c0_17 = arith.constant 0 : index
    %42 = vector.load %arg3[%c0_16, %c0_17] : memref<1x128xf32, #tpu.memory_space<vmem>>, vector<1x128xf32>
    %43 = vector.broadcast %42 : vector<1x128xf32> to vector<16x128xf32>
    %44 = arith.mulf %41, %43 : vector<16x128xf32>
    %c0_18 = arith.constant 0 : index
    %c0_19 = arith.constant 0 : index
    %45 = vector.load %arg4[%c0_18, %c0_19] : memref<1x128xf32, #tpu.memory_space<vmem>>, vector<1x128xf32>
    %46 = vector.broadcast %45 : vector<1x128xf32> to vector<16x128xf32>
    %47 = arith.addf %44, %46 : vector<16x128xf32>
    %cst_20 = arith.constant 0.000000e+00 : f32
    %48 = vector.broadcast %cst_20 : f32 to vector<16x128xf32>
    %49 = arith.maximumf %47, %48 : vector<16x128xf32>
    %cst_21 = arith.constant 0.000000e+00 : f32
    %50 = vector.broadcast %cst_21 : f32 to vector<1x128xf32>
    %51 = vector.extract_strided_slice %49 {offsets = [0, 0], sizes = [15, 128], strides = [1, 1]} : vector<16x128xf32> to vector<15x128xf32>
    %52 = tpu.concatenate %50, %51 in 0 : vector<1x128xf32>, vector<15x128xf32> -> vector<16x128xf32>
    %53 = tpu.iota {dimensions = array<i32: 0>} : vector<16x1xi32>
    %c8_i32_22 = arith.constant 8 : i32
    %c0_i32_23 = arith.constant 0 : i32
    %54 = arith.cmpi eq, %c8_i32_22, %c0_i32_23 : i32
    %c1_i32_24 = arith.constant 1 : i32
    %55 = arith.select %54, %c1_i32_24, %c8_i32_22 : i32
    %56 = vector.broadcast %55 : i32 to vector<16x1xi32>
    %57 = arith.remsi %53, %56 : vector<16x1xi32>
    %c0_i32_25 = arith.constant 0 : i32
    %58 = vector.broadcast %c0_i32_25 : i32 to vector<16x1xi32>
    %59 = arith.cmpi ne, %57, %58 : vector<16x1xi32>
    %c0_i32_26 = arith.constant 0 : i32
    %60 = vector.broadcast %c0_i32_26 : i32 to vector<16x1xi32>
    %61 = arith.cmpi slt, %57, %60 : vector<16x1xi32>
    %c0_i32_27 = arith.constant 0 : i32
    %62 = arith.cmpi slt, %55, %c0_i32_27 : i32
    %63 = vector.broadcast %62 : i1 to vector<16x1xi1>
    %64 = vector.broadcast %63 : vector<16x1xi1> to vector<16x1xi1>
    %65 = arith.xori %61, %64 : vector<16x1xi1>
    %66 = arith.andi %65, %59 : vector<16x1xi1>
    %67 = vector.broadcast %55 : i32 to vector<16x1xi32>
    %68 = arith.addi %57, %67 : vector<16x1xi32>
    %69 = arith.select %66, %68, %57 : vector<16x1xi1>, vector<16x1xi32>
    %c0_i32_28 = arith.constant 0 : i32
    %70 = vector.broadcast %c0_i32_28 : i32 to vector<16x1xi32>
    %71 = arith.cmpi eq, %69, %70 : vector<16x1xi32>
    %cst_29 = arith.constant 0.000000e+00 : f32
    %72 = vector.broadcast %cst_29 : f32 to vector<16x128xf32>
    %73 = vector.shape_cast %71 : vector<16x1xi1> to vector<16x1xi1>
    %74 = vector.broadcast %73 : vector<16x1xi1> to vector<16x128xi1>
    %75 = arith.select %74, %72, %52 : vector<16x128xi1>, vector<16x128xf32>
    %cst_30 = arith.constant 0.000000e+00 : f32
    %76 = vector.broadcast %cst_30 : f32 to vector<1x128xf32>
    %77 = vector.extract_strided_slice %49 {offsets = [1, 0], sizes = [15, 128], strides = [1, 1]} : vector<16x128xf32> to vector<15x128xf32>
    %78 = tpu.concatenate %77, %76 in 0 : vector<15x128xf32>, vector<1x128xf32> -> vector<16x128xf32>
    %79 = tpu.iota {dimensions = array<i32: 0>} : vector<16x1xi32>
    %c8_i32_31 = arith.constant 8 : i32
    %c0_i32_32 = arith.constant 0 : i32
    %80 = arith.cmpi eq, %c8_i32_31, %c0_i32_32 : i32
    %c1_i32_33 = arith.constant 1 : i32
    %81 = arith.select %80, %c1_i32_33, %c8_i32_31 : i32
    %82 = vector.broadcast %81 : i32 to vector<16x1xi32>
    %83 = arith.remsi %79, %82 : vector<16x1xi32>
    %c0_i32_34 = arith.constant 0 : i32
    %84 = vector.broadcast %c0_i32_34 : i32 to vector<16x1xi32>
    %85 = arith.cmpi ne, %83, %84 : vector<16x1xi32>
    %c0_i32_35 = arith.constant 0 : i32
    %86 = vector.broadcast %c0_i32_35 : i32 to vector<16x1xi32>
    %87 = arith.cmpi slt, %83, %86 : vector<16x1xi32>
    %c0_i32_36 = arith.constant 0 : i32
    %88 = arith.cmpi slt, %81, %c0_i32_36 : i32
    %89 = vector.broadcast %88 : i1 to vector<16x1xi1>
    %90 = vector.broadcast %89 : vector<16x1xi1> to vector<16x1xi1>
    %91 = arith.xori %87, %90 : vector<16x1xi1>
    %92 = arith.andi %91, %85 : vector<16x1xi1>
    %93 = vector.broadcast %81 : i32 to vector<16x1xi32>
    %94 = arith.addi %83, %93 : vector<16x1xi32>
    %95 = arith.select %92, %94, %83 : vector<16x1xi1>, vector<16x1xi32>
    %c7_i32 = arith.constant 7 : i32
    %96 = vector.broadcast %c7_i32 : i32 to vector<16x1xi32>
    %97 = arith.cmpi eq, %95, %96 : vector<16x1xi32>
    %cst_37 = arith.constant 0.000000e+00 : f32
    %98 = vector.broadcast %cst_37 : f32 to vector<16x128xf32>
    %99 = vector.shape_cast %97 : vector<16x1xi1> to vector<16x1xi1>
    %100 = vector.broadcast %99 : vector<16x1xi1> to vector<16x128xi1>
    %101 = arith.select %100, %98, %78 : vector<16x128xi1>, vector<16x128xf32>
    %102 = arith.truncf %75 : vector<16x128xf32> to vector<16x128xbf16>
    %c0_38 = arith.constant 0 : index
    %c0_39 = arith.constant 0 : index
    %c0_40 = arith.constant 0 : index
    %103 = vector.load %arg5[%c0_38, %c0_39, %c0_40] : memref<3x128x128xbf16, #tpu.memory_space<vmem>>, vector<1x128x128xbf16>
    %104 = vector.shape_cast %103 : vector<1x128x128xbf16> to vector<128x128xbf16>
    %cst_41 = arith.constant dense<0.000000e+00> : vector<16x128xf32>
    %105 = tpu.matmul %102, %104, %cst_41 {dimension_numbers = #tpu.dot_dimension_numbers<[1], [0], [0], [1], [0, 0, 1, 1], [], []>} : vector<16x128xbf16>, vector<128x128xbf16>, vector<16x128xf32> -> vector<16x128xf32>
    %106 = arith.truncf %49 : vector<16x128xf32> to vector<16x128xbf16>
    %c1_42 = arith.constant 1 : index
    %c0_43 = arith.constant 0 : index
    %c0_44 = arith.constant 0 : index
    %107 = vector.load %arg5[%c1_42, %c0_43, %c0_44] : memref<3x128x128xbf16, #tpu.memory_space<vmem>>, vector<1x128x128xbf16>
    %108 = vector.shape_cast %107 : vector<1x128x128xbf16> to vector<128x128xbf16>
    %cst_45 = arith.constant dense<0.000000e+00> : vector<16x128xf32>
    %109 = tpu.matmul %106, %108, %cst_45 {dimension_numbers = #tpu.dot_dimension_numbers<[1], [0], [0], [1], [0, 0, 1, 1], [], []>} : vector<16x128xbf16>, vector<128x128xbf16>, vector<16x128xf32> -> vector<16x128xf32>
    %110 = arith.addf %105, %109 : vector<16x128xf32>
    %111 = arith.truncf %101 : vector<16x128xf32> to vector<16x128xbf16>
    %c2_46 = arith.constant 2 : index
    %c0_47 = arith.constant 0 : index
    %c0_48 = arith.constant 0 : index
    %112 = vector.load %arg5[%c2_46, %c0_47, %c0_48] : memref<3x128x128xbf16, #tpu.memory_space<vmem>>, vector<1x128x128xbf16>
    %113 = vector.shape_cast %112 : vector<1x128x128xbf16> to vector<128x128xbf16>
    %cst_49 = arith.constant dense<0.000000e+00> : vector<16x128xf32>
    %114 = tpu.matmul %111, %113, %cst_49 {dimension_numbers = #tpu.dot_dimension_numbers<[1], [0], [0], [1], [0, 0, 1, 1], [], []>} : vector<16x128xbf16>, vector<128x128xbf16>, vector<16x128xf32> -> vector<16x128xf32>
    %115 = arith.addf %110, %114 : vector<16x128xf32>
    %c0_50 = arith.constant 0 : index
    %c0_51 = arith.constant 0 : index
    %116 = vector.load %arg6[%c0_50, %c0_51] : memref<1x128xf32, #tpu.memory_space<vmem>>, vector<1x128xf32>
    %117 = vector.broadcast %116 : vector<1x128xf32> to vector<16x128xf32>
    %118 = arith.mulf %115, %117 : vector<16x128xf32>
    %c0_52 = arith.constant 0 : index
    %c0_53 = arith.constant 0 : index
    %119 = vector.load %arg7[%c0_52, %c0_53] : memref<1x128xf32, #tpu.memory_space<vmem>>, vector<1x128xf32>
    %120 = vector.broadcast %119 : vector<1x128xf32> to vector<16x128xf32>
    %121 = arith.addf %118, %120 : vector<16x128xf32>
    %c0_54 = arith.constant 0 : index
    %c0_55 = arith.constant 0 : index
    %122 = vector.load %arg8[%c0_54, %c0_55] : memref<128x128xbf16, #tpu.memory_space<vmem>>, vector<128x128xbf16>
    %cst_56 = arith.constant dense<0.000000e+00> : vector<16x128xf32>
    %123 = tpu.matmul %1, %122, %cst_56 {dimension_numbers = #tpu.dot_dimension_numbers<[1], [0], [0], [1], [0, 0, 1, 1], [], []>} : vector<16x128xbf16>, vector<128x128xbf16>, vector<16x128xf32> -> vector<16x128xf32>
    %c0_57 = arith.constant 0 : index
    %c0_58 = arith.constant 0 : index
    %124 = vector.load %arg9[%c0_57, %c0_58] : memref<1x128xf32, #tpu.memory_space<vmem>>, vector<1x128xf32>
    %125 = vector.broadcast %124 : vector<1x128xf32> to vector<16x128xf32>
    %126 = arith.mulf %123, %125 : vector<16x128xf32>
    %c0_59 = arith.constant 0 : index
    %c0_60 = arith.constant 0 : index
    %127 = vector.load %arg10[%c0_59, %c0_60] : memref<1x128xf32, #tpu.memory_space<vmem>>, vector<1x128xf32>
    %128 = vector.broadcast %127 : vector<1x128xf32> to vector<16x128xf32>
    %129 = arith.addf %126, %128 : vector<16x128xf32>
    %130 = arith.addf %121, %129 : vector<16x128xf32>
    %cst_61 = arith.constant 0.000000e+00 : f32
    %131 = vector.broadcast %cst_61 : f32 to vector<16x128xf32>
    %132 = arith.maximumf %130, %131 : vector<16x128xf32>
    %133 = arith.truncf %132 : vector<16x128xf32> to vector<16x128xbf16>
    %c0_62 = arith.constant 0 : index
    %c0_63 = arith.constant 0 : index
    %134 = vector.load %arg11[%c0_62, %c0_63] : memref<16x128xbf16, #tpu.memory_space<vmem>>, vector<16x128xbf16>
    tpu.vector_store %arg11[%c0_62, %c0_63], %133 {strides = array<i32>} : memref<16x128xbf16, #tpu.memory_space<vmem>>, vector<16x128xbf16>,
    return
  }
  func.func @transform_0(%arg0: i32) -> (i32, i32) {
    %c0_i32 = arith.constant 0 : i32
    %c0_i32_0 = arith.constant 0 : i32
    return %arg0, %c0_i32 : i32, i32
  }
  func.func @transform_1(%arg0: i32) -> (i32, i32, i32) {
    %c0_i32 = arith.constant 0 : i32
    %c0_i32_0 = arith.constant 0 : i32
    %c0_i32_1 = arith.constant 0 : i32
    %c0_i32_2 = arith.constant 0 : i32
    return %c0_i32, %c0_i32_0, %c0_i32_1 : i32, i32, i32
  }
  func.func @transform_2(%arg0: i32) -> (i32, i32) {
    %c0_i32 = arith.constant 0 : i32
    %c0_i32_0 = arith.constant 0 : i32
    %c0_i32_1 = arith.constant 0 : i32
    return %c0_i32, %c0_i32_0 : i32, i32
  }
  func.func @transform_3(%arg0: i32) -> (i32, i32) {
    %c0_i32 = arith.constant 0 : i32
    %c0_i32_0 = arith.constant 0 : i32
    %c0_i32_1 = arith.constant 0 : i32
    return %c0_i32, %c0_i32_0 : i32, i32
  }
  func.func @transform_4(%arg0: i32) -> (i32, i32, i32) {
    %c0_i32 = arith.constant 0 : i32
    %c0_i32_0 = arith.constant 0 : i32
    %c0_i32_1 = arith.constant 0 : i32
    %c0_i32_2 = arith.constant 0 : i32
    return %c0_i32, %c0_i32_0, %c0_i32_1 : i32, i32, i32
  }
  func.func @transform_5(%arg0: i32) -> (i32, i32) {
    %c0_i32 = arith.constant 0 : i32
    %c0_i32_0 = arith.constant 0 : i32
    %c0_i32_1 = arith.constant 0 : i32
    return %c0_i32, %c0_i32_0 : i32, i32
  }
  func.func @transform_6(%arg0: i32) -> (i32, i32) {
    %c0_i32 = arith.constant 0 : i32
    %c0_i32_0 = arith.constant 0 : i32
    %c0_i32_1 = arith.constant 0 : i32
    return %c0_i32, %c0_i32_0 : i32, i32
  }
  func.func @transform_7(%arg0: i32) -> (i32, i32) {
    %c0_i32 = arith.constant 0 : i32
    %c0_i32_0 = arith.constant 0 : i32
    %c0_i32_1 = arith.constant 0 : i32
    return %c0_i32, %c0_i32_0 : i32, i32
  }
  func.func @transform_8(%arg0: i32) -> (i32, i32) {
    %c0_i32 = arith.constant 0 : i32
    %c0_i32_0 = arith.constant 0 : i32
    %c0_i32_1 = arith.constant 0 : i32
    return %c0_i32, %c0_i32_0 : i32, i32
  }
  func.func @transform_9(%arg0: i32) -> (i32, i32) {
    %c0_i32 = arith.constant 0 : i32
    %c0_i32_0 = arith.constant 0 : i32
    %c0_i32_1 = arith.constant 0 : i32
    return %c0_i32, %c0_i32_0 : i32, i32
  }
  func.func @transform_10(%arg0: i32) -> (i32, i32) {
    %c0_i32 = arith.constant 0 : i32
    %c0_i32_0 = arith.constant 0 : i32
    return %arg0, %c0_i32 : i32, i32
  }
}

</mosaic_0001>

<bundles_post_ra>
// kernel: tpu_custom_call.1
= control target key start
LH: loop header
LB: loop body
LE: loop exit
PB: predicated region body
PF: predicated region fallthrough
CT: control target
= control target key end

     0   :  { %15 = vsyncpa [#allocation3], 0  ;;  %s1424_s0 = inlined_call_operand.hbm [shape: bf16[16,256], index: 0, kind: input, shape index: {}]   ;;  %s1425_s1 = inlined_call_operand.hbm [shape: bf16[3,128,128], index: 1, kind: input, shape index: {}]   ;;  %s1426_s2 = inlined_call_operand.vmem [shape: f32[1,128], index: 2, kind: input, shape index: {}]   ;;  %s1427_s3 = inlined_call_operand.vmem [shape: f32[1,128], index: 3, kind: input, shape index: {}]   ;;  %s1428_s4 = inlined_call_operand.hbm [shape: bf16[3,128,128], index: 4, kind: input, shape index: {}]   ;;  %s1429_s5 = inlined_call_operand.vmem [shape: f32[1,128], index: 5, kind: input, shape index: {}]   ;;  %s1430_s6 = inlined_call_operand.vmem [shape: f32[1,128], index: 6, kind: input, shape index: {}]   ;;  %s1431_s7 = inlined_call_operand.hbm [shape: bf16[128,128], index: 7, kind: input, shape index: {}]   ;;  %s1432_s8 = inlined_call_operand.vmem [shape: f32[1,128], index: 8, kind: input, shape index: {}]   ;;  %s1433_s9 = inlined_call_operand.vmem [shape: f32[1,128], index: 9, kind: input, shape index: {}]   ;;  %s1434_s10 = inlined_call_operand.hbm [shape: bf16[16,128], index: 10, kind: output, shape index: {}]  }
   0x1   :  { %16 = vsyncpa [#allocation6], 0 }
   0x2   :  { %17 = vsyncpa [#allocation9], 0  ;;  %s36_s15 = sshll.u32 %s1425_s1, 4  ;;  %s37_s15 = int_to_ptr.hbm [resolvable:$true] %s36_s15 }
   0x3   :  { %18 = vsyncpa [#allocation4], 0  ;;  %s1268_s16 = smov [#allocation5]   ;;  %s23_s20 = sshll.u32 %s1424_s0, 4  ;;  %s24_s20 = int_to_ptr.hbm [resolvable:$true] %s23_s20 }
   0x4   :  { %s38_s17 = sshll.u32 %s1268_s16, 4  ;;  %s1269_s21 = smov 64   ;;  %s39_s17 = int_to_ptr.vmem [resolvable:$true] %s38_s17 }
   0x5   :  { %s1270_s22 = smov 4   ;;  %s1271_s23 = smov [#allocation2]  }
   0x6   :  { %44 = dma.hbm_to_vmem [thread:$0]  %s37_s15, 3072, %s39_s17, [#allocation6], %s1269_s21, %s1269_s21, %s1270_s22  }
   0x7   :  { %s25_s24 = sshll.u32 %s1271_s23, 4  ;;  %s1272_s1 = smov 128   ;;  %s26_s24 = int_to_ptr.vmem [resolvable:$true] %s25_s24 }
   0x8   :  { %s1273_s25 = smov 8   ;;  %s53_s28 = sshll.u32 %s1428_s4, 4  ;;  %s54_s28 = int_to_ptr.hbm [resolvable:$true] %s53_s28 }
   0x9   :  { %31 = dma.hbm_to_vmem [thread:$0]  %s24_s20, 256, %s26_s24, [#allocation3], %s1272_s1, %s1272_s1, %s1273_s25  }
   0xa   :  { %s1274_s29 = smov [#allocation7]   ;;  %s70_s12 = sshll.u32 %s1431_s7, 4  ;;  %s71_s12 = int_to_ptr.hbm [resolvable:$true] %s70_s12 }
   0xb   :  { %s55_s0 = sshll.u32 %s1274_s29, 4  ;;  %s1275_s13 = smov [#allocation8]   ;;  %s56_s0 = int_to_ptr.vmem [resolvable:$true] %s55_s0 }
   0xc   :  { %61 = dma.hbm_to_vmem [thread:$0]  %s54_s28, 3072, %s56_s0, [#allocation6], %s1269_s21, %s1269_s21, %s1270_s22  }
   0xd   :  { %s72_s14 = sshll.u32 %s1275_s13, 4  ;;  %s73_s14 = int_to_ptr.vmem [resolvable:$true] %s72_s14 }
   0xe   :  { %78 = dma.hbm_to_vmem [thread:$0]  %s71_s12, 1024, %s73_s14, [#allocation9], %s1269_s21, %s1269_s21, %s1270_s22  }
   0xf   :  { %1260 = dma.done.wait [#allocation3], 256  }
  0x10   :  { %1261 = vsyncadd [#allocation3], 4294967040 }
  0x11   :  { %1262 = dma.done.wait [#allocation6], 6144  }
  0x12   :  { %1263 = vsyncadd [#allocation6], 4294961152 }
  0x13   :  { %1264 = dma.done.wait [#allocation9], 1024  }
  0x14   :  { %1265 = vsyncadd [#allocation9], 4294966272  ;;  %v1075_v0 = vld [vmem:[#allocation5 + $0x78] sm:$0xff]  ;;  %v1074_v3 = vld [vmem:[#allocation5 + $0x70] sm:$0xff]  ;;  %v118_v15 = vlaneseq  ;;  %vm111_vm0 = vcmask 1040384   ;;  %vm424_vm4 = vcmask 1046528  }
  0x15   :  { %v1067_v1 = vld [vmem:[#allocation5 + $0x38] sm:$0xff]  ;;  %239 = vmatpush.bf16.msra.mxu0 %v1075_v0  ;;  %v1066_v4 = vld [vmem:[#allocation5 + $0x30] sm:$0xff]  ;;  %v1073_v6 = vld [vmem:[#allocation5 + $0x68] sm:$0xff] }
  0x16   :  { %v1083_v2 = vld [vmem:[#allocation5 + $0xb8] sm:$0xff]  ;;  %301 = vmatpush.bf16.msra.mxu1 %v1067_v1  ;;  %v1082_v5 = vld [vmem:[#allocation5 + $0xb0] sm:$0xff]  ;;  %v1065_v7 = vld [vmem:[#allocation5 + $0x28] sm:$0xff]  ;;  %v1353_v22 = vshrl.u32 %v118_v15, 7 }
  0x17   :  { %384 = vmatpush.bf16.msra.mxu2 %v1083_v2  ;;  %v1081_v8 = vld [vmem:[#allocation5 + $0xa8] sm:$0xff]  ;;  %v1072_v9 = vld [vmem:[#allocation5 + $0x60] sm:$0xff]  ;;  %v1099_v11 = vld [vmem:[#allocation7 + $0x78] sm:$0xff] }
  0x18   :  { %v1064_v10 = vld [vmem:[#allocation5 + $0x20] sm:$0xff]  ;;  %v99_v13 = vld [vmem:[#allocation2] sm:$0xff]  ;;  %v100_v14 = vld [vmem:[#allocation2 + $0x8] sm:$0xff]  ;;  %522 = vmatpush.bf16.msra.mxu3 %v1099_v11  ;;  %v1356_v28 = vadd.s32 8, %v1353_v22  ;;  %v125_v29 = vand.u32 7, %v1353_v22 }
  0x19   :  { %240 = vmatpush.bf16.msra.mxu0 %v1074_v3  ;;  %v1080_v12 = vld [vmem:[#allocation5 + $0xa0] sm:$0xff]  ;;  %v1071_v16 = vld [vmem:[#allocation5 + $0x58] sm:$0xff]  ;;  %v1098_v17 = vld [vmem:[#allocation7 + $0x70] sm:$0xff]  ;;  %v103_v19 = vrot.slane %v99_v13, 4  ;;  %v104_v20 = vrot.slane %v100_v14, 4 }
  0x1a   :  { %302 = vmatpush.bf16.msra.mxu1 %v1066_v4  ;;  %v1063_v18 = vld [vmem:[#allocation5 + $0x18] sm:$0xff]  ;;  %v1070_v23 = vld [vmem:[#allocation5 + $0x50] sm:$0xff]  ;;  %v1069_v30 = vld [vmem:[#allocation5 + $0x48] sm:$0xff]  ;;  %v132_v35 = vand.u32 7, %v1356_v28  ;;  %vm1362_vm1 = vcmp.ne.s32.totalorder %v125_v29, 0  ;;  %vm1122_vm6 = vcmp.ne.s32.totalorder %v125_v29, 7 }
  0x1b   :  { %385 = vmatpush.bf16.msra.mxu2 %v1082_v5  ;;  %v1079_v21 = vld [vmem:[#allocation5 + $0x98] sm:$0xff]  ;;  %v1062_v24 = vld [vmem:[#allocation5 + $0x10] sm:$0xff]  ;;  %v107_v25 = vunpack.c.l.bf16 %v103_v19  ;;  %v108_v26 = vunpack.c.l.bf16 %v104_v20  ;;  %v1061_v31 = vld [vmem:[#allocation5 + $0x8] sm:$0xff] }
  0x1c   :  { %523 = vmatpush.bf16.msra.mxu3 %v1098_v17  ;;  %v1078_v27 = vld [vmem:[#allocation5 + $0x90] sm:$0xff]  ;;  %v1077_v34 = vld [vmem:[#allocation5 + $0x88] sm:$0xff]  ;;  %v1068_v36 = vld [vmem:[#allocation5 + $0x40] sm:$0xff]  ;;  %vm1370_vm2 = vcmp.ne.s32.totalorder %v132_v35, 0  ;;  %vm1391_vm5 = vcmp.ne.s32.totalorder %v132_v35, 7 }
  0x1d   :  { %241 = vmatpush.bf16.msra.mxu0 %v1073_v6  ;;  %v112_v32 = vrot.slane %v107_v25, 7  ;;  %v113_v33 = vrot.slane %v108_v26, 7  ;;  %v1060_v37 = vld [vmem:[#allocation5] sm:$0xff]  ;;  %v813_v40 = vld [vmem:[#allocation2] sm:$0xf]  ;;  %v1091_v47 = vld [vmem:[#allocation7 + $0x38] sm:$0xff] }
  0x1e   :  { %303 = vmatpush.bf16.msra.mxu1 %v1065_v7  ;;  %v1076_v39 = vld [vmem:[#allocation5 + $0x80] sm:$0xff]  ;;  %v1059_v41 = vld [vmem:[#allocation2 + $0x4] sm:$0xf0]  ;;  %v1058_v45 = vld [vmem:[#allocation2 + $0x4] sm:$0xf] }
  0x1f   :  { %386 = vmatpush.bf16.msra.mxu2 %v1081_v8  ;;  %v114_v42 = vsel %vm111_vm0, %v112_v32, %v113_v33  ;;  %v117_v43 = vsel %vm111_vm0, 0.0, %v112_v32  ;;  %v884_v46 = vld [vmem:[#allocation2 + $0x8] sm:$0xf0]  ;;  %v814_v50 = vor.u32 %v1059_v41, %v813_v40  ;;  %vm881_vm3 = vmpackc.low %vm1370_vm2, %vm1362_vm1  ;;  %v1114_v53 = vld [vmem:[#allocation8 + $0x30] sm:$0xff] }
  0x20   :  { %v1115_v48 = vld [vmem:[#allocation8 + $0x38] sm:$0xff]  ;;  %v882_v51 = vpack.c.bf16 %v114_v42, %v117_v43  ;;  %v887_v52 = vor.u32 %v1058_v45, %v884_v46  ;;  %v1113_v54 = vld [vmem:[#allocation8 + $0x28] sm:$0xff]  ;;  %v1090_v55 = vld [vmem:[#allocation7 + $0x30] sm:$0xff] }
  0x21   :  { %242 = vmatpush.bf16.msra.mxu0 %v1072_v9  ;;  %v1107_v49 = vld [vmem:[#allocation7 + $0xb8] sm:$0xff]  ;;  %v1106_v56 = vld [vmem:[#allocation7 + $0xb0] sm:$0xff]  ;;  %v1097_v57 = vld [vmem:[#allocation7 + $0x68] sm:$0xff] }
  0x22   :  { %304 = vmatpush.bf16.msra.mxu1 %v1064_v10  ;;  %v1112_v58 = vld [vmem:[#allocation8 + $0x20] sm:$0xff]  ;;  %v1089_v59 = vld [vmem:[#allocation7 + $0x28] sm:$0xff]  ;;  %524 = vmatpush.bf16.msra.mxu3 %v1097_v57  ;;  %v1111_v62 = vld [vmem:[#allocation8 + $0x18] sm:$0xff] }
  0x23   :  { %387 = vmatpush.bf16.msra.mxu2 %v1080_v12  ;;  %v1105_v60 = vld [vmem:[#allocation7 + $0xa8] sm:$0xff]  ;;  %v1096_v61 = vld [vmem:[#allocation7 + $0x60] sm:$0xff]  ;;  %v1095_v1 = vld [vmem:[#allocation7 + $0x58] sm:$0xff] }
  0x24   :  { %v1088_v63 = vld [vmem:[#allocation7 + $0x20] sm:$0xff]  ;;  %v1110_v2 = vld [vmem:[#allocation8 + $0x10] sm:$0xff]  ;;  %v1087_v3 = vld [vmem:[#allocation7 + $0x18] sm:$0xff] }
  0x25   :  { %243 = vmatpush.bf16.msra.mxu0 %v1071_v16  ;;  %v1104_v0 = vld [vmem:[#allocation7 + $0xa0] sm:$0xff]  ;;  %v1103_v4 = vld [vmem:[#allocation7 + $0x98] sm:$0xff]  ;;  %v1094_v5 = vld [vmem:[#allocation7 + $0x50] sm:$0xff] }
  0x26   :  { %305 = vmatpush.bf16.msra.mxu1 %v1063_v18  ;;  %525 = vmatpush.bf16.msra.mxu3 %v1096_v61  ;;  %v1109_v6 = vld [vmem:[#allocation8 + $0x8] sm:$0xff]  ;;  %v1086_v7 = vld [vmem:[#allocation7 + $0x10] sm:$0xff]  ;;  %v1108_v10 = vld [vmem:[#allocation8] sm:$0xff] }
  0x27   :  { %388 = vmatpush.bf16.msra.mxu2 %v1079_v21  ;;  %v1102_v8 = vld [vmem:[#allocation7 + $0x90] sm:$0xff]  ;;  %v1093_v9 = vld [vmem:[#allocation7 + $0x48] sm:$0xff]  ;;  %v1092_v13 = vld [vmem:[#allocation7 + $0x40] sm:$0xff] }
  0x28   :  { %v1085_v11 = vld [vmem:[#allocation7 + $0x8] sm:$0xff]  ;;  %v1084_v14 = vld [vmem:[#allocation7] sm:$0xff]  ;;  %v1134_v19 = vld [vmem:[%s1426_s2] ss:$0 sm:$0xff] }
  0x29   :  { %244 = vmatpush.bf16.msra.mxu0 %v1070_v23  ;;  %v1101_v12 = vld [vmem:[#allocation7 + $0x88] sm:$0xff]  ;;  %v1100_v15 = vld [vmem:[#allocation7 + $0x80] sm:$0xff]  ;;  %vm1023_vm7 = vmpackc.low %vm1391_vm5, %vm1122_vm6 }
  0x2a   :  { %306 = vmatpush.bf16.msra.mxu1 %v1062_v24  ;;  %526 = vmatpush.bf16.msra.mxu3 %v1095_v1  ;;  %v1135_v24 = vld [vmem:[%s1427_s3] ss:$0 sm:$0xff] }
  0x2b   :  { %389 = vmatpush.bf16.msra.mxu2 %v1078_v27  ;;  %v1137_v38 = vld [vmem:[%s1433_s9] ss:$0 sm:$0xff] }
  0x2c   :  { %v1139_v57 = vld [vmem:[%s1430_s6] ss:$0 sm:$0xff]  ;;  %s796_s6 = sshll.u32 %s1434_s10, 4  ;;  %s797_s6 = int_to_ptr.hbm [resolvable:$true] %s796_s6 }
  0x2d   :  { %245 = vmatpush.bf16.msra.mxu0 %v1069_v30 }
  0x2e   :  { %307 = vmatpush.bf16.msra.mxu1 %v1061_v31  ;;  %527 = vmatpush.bf16.msra.mxu3 %v1094_v5 }
  0x2f   :  { %390 = vmatpush.bf16.msra.mxu2 %v1077_v34 }
  0x31   :  { %246 = vmatpush.bf16.msra.mxu0 %v1068_v36 }
  0x32   :  { %308 = vmatpush.bf16.msra.mxu1 %v1060_v37  ;;  %528 = vmatpush.bf16.msra.mxu3 %v1093_v9 }
  0x33   :  { %391 = vmatpush.bf16.msra.mxu2 %v1076_v39 }
  0x34   :  { %247 = vmatmul.bf16.vlgmr.msra.gmra.mxu0 %v814_v50 }
  0x35   :  { %584 = vmatpush.bf16.msrb.mxu0 %v1091_v47  ;;  %883 = vmatmul.msk.bf16.vlgmr.msra.gmra.mxu1 %vm881_vm3, %v882_v51 }
  0x36   :  { %664 = vmatpush.bf16.msrb.mxu1 %v1107_v49  ;;  %392 = vmatmul.bf16.vlgmr.msra.gmra.mxu2 %v887_v52 }
  0x37   :  { %756 = vmatpush.bf16.msrb.mxu2 %v1115_v48  ;;  %529 = vmatpush.bf16.msra.mxu3 %v1092_v13 }
  0x39   :  { %585 = vmatpush.bf16.msrb.mxu0 %v1090_v55  ;;  %v1138_v55 = vld [vmem:[%s1429_s5] ss:$0 sm:$0xff]  ;;  %s1276_s5 = smov [#allocation10]  }
  0x3a   :  { %665 = vmatpush.bf16.msrb.mxu1 %v1106_v56 }
  0x3b   :  { %757 = vmatpush.bf16.msrb.mxu2 %v1114_v53  ;;  %v1136_v53 = vld [vmem:[%s1432_s8] ss:$0 sm:$0xff]  ;;  %s794_s8 = sshll.u32 %s1276_s5, 4  ;;  %s795_s8 = int_to_ptr.vmem [resolvable:$true] %s794_s8 }
  0x3d   :  { %586 = vmatpush.bf16.msrb.mxu0 %v1089_v59 }
  0x3e   :  { %666 = vmatpush.bf16.msrb.mxu1 %v1105_v60 }
  0x3f   :  { %758 = vmatpush.bf16.msrb.mxu2 %v1113_v54 }
  0x41   :  { %587 = vmatpush.bf16.msrb.mxu0 %v1088_v63 }
  0x42   :  { %667 = vmatpush.bf16.msrb.mxu1 %v1104_v0 }
  0x43   :  { %759 = vmatpush.bf16.msrb.mxu2 %v1112_v58 }
  0x45   :  { %588 = vmatpush.bf16.msrb.mxu0 %v1087_v3 }
  0x46   :  { %668 = vmatpush.bf16.msrb.mxu1 %v1103_v4 }
  0x47   :  { %760 = vmatpush.bf16.msrb.mxu2 %v1111_v62 }
  0x49   :  { %589 = vmatpush.bf16.msrb.mxu0 %v1086_v7 }
  0x4a   :  { %669 = vmatpush.bf16.msrb.mxu1 %v1102_v8 }
  0x4b   :  { %761 = vmatpush.bf16.msrb.mxu2 %v1110_v2 }
  0x4d   :  { %590 = vmatpush.bf16.msrb.mxu0 %v1085_v11 }
  0x4e   :  { %670 = vmatpush.bf16.msrb.mxu1 %v1101_v12 }
  0x4f   :  { %762 = vmatpush.bf16.msrb.mxu2 %v1109_v6 }
  0x51   :  { %591 = vmatpush.bf16.msrb.mxu0 %v1084_v14 }
  0x52   :  { %671 = vmatpush.bf16.msrb.mxu1 %v1100_v15 }
  0x53   :  { %763 = vmatpush.bf16.msrb.mxu2 %v1108_v10 }
  0x56   :  { %764 = vmatmul.bf16.vlgmr.msrb.gmra.mxu2 %v814_v50 }
  0xb1   :  { %v248_v16 = vpop.f32.mrf.mxu0 }
  0xb2   :  { %v310_v17 = vpop.f32.mrf.mxu1 }
  0xb3   :  { %v311_v18 = vadd.f32 %v310_v17, %v248_v16 }
  0xb9   :  { %v393_v20 = vpop.f32.mrf.mxu2  ;;  %v250_v25 = vpop.f32.mrf.mxu0 }
  0xba   :  { %v398_v21 = vadd.f32 %v393_v20, %v311_v18  ;;  %v312_v26 = vpop.f32.mrf.mxu1 }
  0xbb   :  { %v313_v30 = vadd.f32 %v312_v26, %v250_v25 }
  0xbc   :  { %v404_v23 = vmul.f32 %v1134_v19, %v398_v21 }
  0xbe   :  { %v410_v27 = vadd.f32 %v1135_v24, %v404_v23 }
  0xc0   :  { %v412_v33 = vmax.f32 %v410_v27, 0.0 }
  0xc1   :  { %v395_v31 = vpop.f32.mrf.mxu2 }
  0xc2   :  { %v399_v32 = vadd.f32 %v395_v31, %v313_v30  ;;  %v416_v37 = vrot.slane %v412_v33, 7  ;;  %v425_v41 = vrot.slane %v412_v33, 1 }
  0xc4   :  { %v405_v34 = vmul.f32 %v1134_v19, %v399_v32  ;;  %v421_v47 = vsel %vm111_vm0, 0.0, %v416_v37 }
  0xc6   :  { %v411_v36 = vadd.f32 %v1135_v24, %v405_v34 }
  0xc8   :  { %v413_v39 = vmax.f32 %v411_v36, 0.0 }
  0xca   :  { %v417_v42 = vrot.slane %v413_v39, 7  ;;  %v426_v43 = vrot.slane %v413_v39, 1  ;;  %v456_v45 = vpack.c.bf16 %v413_v39, %v412_v33 }
  0xcc   :  { %530 = vmatmul.bf16.vlgmr.msra.gmra.mxu3 %v456_v45  ;;  %v418_v46 = vsel %vm111_vm0, %v416_v37, %v417_v42  ;;  %v427_v48 = vsel %vm424_vm4, %v425_v41, %v426_v43  ;;  %v430_v49 = vsel %vm424_vm4, %v426_v43, 0.0 }
  0xcd   :  { %v987_v28 = vpack.c.bf16 %v418_v46, %v421_v47  ;;  %v1024_v35 = vpack.c.bf16 %v430_v49, %v427_v48 }
  0xcf   :  { %988 = vmatmul.msk.bf16.vlgmr.msrb.gmra.mxu0 %vm881_vm3, %v987_v28  ;;  %1025 = vmatmul.msk.bf16.vlgmr.msrb.gmra.mxu1 %vm1023_vm7, %v1024_v35 }
  0xd9   :  { %v765_v22 = vpop.f32.mrf.mxu2 }
  0xda   :  { %v774_v44 = vmul.f32 %v1136_v53, %v765_v22 }
  0xdc   :  { %v780_v63 = vadd.f32 %v1137_v38, %v774_v44 }
  0xe1   :  { %v767_v58 = vpop.f32.mrf.mxu2 }
  0xe2   :  { %v775_v1 = vmul.f32 %v1136_v53, %v767_v58 }
  0xe4   :  { %v781_v4 = vadd.f32 %v1137_v38, %v775_v1 }
 0x14c   :  { %v593_v29 = vpop.f32.mrf.mxu0  ;;  %v673_v50 = vpop.f32.mrf.mxu1 }
 0x14f   :  { %v531_v51 = vpop.f32.mrf.mxu3 }
 0x150   :  { %v594_v52 = vadd.f32 %v593_v29, %v531_v51 }
 0x152   :  { %v678_v54 = vadd.f32 %v673_v50, %v594_v52 }
 0x154   :  { %v684_v56 = vmul.f32 %v1138_v55, %v678_v54  ;;  %v595_v59 = vpop.f32.mrf.mxu0  ;;  %v675_v62 = vpop.f32.mrf.mxu1 }
 0x156   :  { %v690_v0 = vadd.f32 %v1139_v57, %v684_v56 }
 0x157   :  { %v533_v60 = vpop.f32.mrf.mxu3 }
 0x158   :  { %v596_v61 = vadd.f32 %v595_v59, %v533_v60  ;;  %v782_v6 = vadd.f32 %v780_v63, %v690_v0 }
 0x15a   :  { %v679_v2 = vadd.f32 %v675_v62, %v596_v61  ;;  %v784_v8 = vmax.f32 %v782_v6, 0.0 }
 0x15c   :  { %v685_v3 = vmul.f32 %v1138_v55, %v679_v2 }
 0x15e   :  { %v691_v5 = vadd.f32 %v1139_v57, %v685_v3 }
 0x160   :  { %v783_v7 = vadd.f32 %v781_v4, %v691_v5 }
 0x162   :  { %v785_v9 = vmax.f32 %v783_v7, 0.0 }
 0x164   :  { %v1119_v10 = vpack.c.bf16 %v785_v9, %v784_v8 }
 0x166   :  { %1120 = vst [vmem:[#allocation10] sm:$0xff] %v1119_v10  }
 0x167   :  { %802 = dma.vmem_to_hbm [thread:$0]  %s795_s8, 128, %s797_s6, [#allocation4], %s1269_s21, %s1269_s21, %s1270_s22  }
 0x168   :  { %1266 = dma.done.wait [#allocation4], 128  }
 0x169   :  { %1267 = vsyncadd [#allocation4], 4294967168 }
 0x16a   :  { %807 = vsyncpa [#allocation3], 1 }
 0x16b   :  { %808 = vsyncpa [#allocation6], 1 }
 0x16c   :  { %809 = vsyncpa [#allocation9], 1 }
 0x16d   :  { %810 = vsyncpa [#allocation4], 1 }

</bundles_post_ra>
